<compile_context>
chip_gen: v7x
topology: tpu7x:2x2x1
jax: 0.10.0
libtpu: 0.0.40
codegen_flags: <defaults>
</compile_context>

<pallas_src>
import functools

import jax
import jax.numpy as jnp
from jax.experimental import pallas as pl
from jax.experimental.pallas import tpu as pltpu


def _round_up(x, m):
    return ((x + m - 1) // m) * m


def _hidden_act(h, kind):
    if kind == "relu":
        return jnp.maximum(h, 0.0)
    if kind == "tanh":
        return jnp.tanh(h)
    raise ValueError(f"unsupported hidden activation: {kind!r}")


def _actor_kernel(obs_ref, goal_ref, w1o_ref, w1g_ref, b1_ref,
                  w2_ref, b2_ref, w3_ref, b3_ref, o_ref, *,
                  act_limit, hidden_activation):
    mm_dt = w1o_ref.dtype  # matmul operand dtype (bf16), f32 accumulation

    # Layer 1: fused concat -> split matmul (obs slab + goal slab) + bias + act
    h = (jnp.dot(obs_ref[...].astype(mm_dt), w1o_ref[...],
                 preferred_element_type=jnp.float32)
         + jnp.dot(goal_ref[...].astype(mm_dt), w1g_ref[...],
                   preferred_element_type=jnp.float32)
         + b1_ref[...])
    h = _hidden_act(h, hidden_activation)

    # Layer 2: Linear + act
    h = jnp.dot(h.astype(mm_dt), w2_ref[...],
                preferred_element_type=jnp.float32) + b2_ref[...]
    h = _hidden_act(h, hidden_activation)

    # Output layer (lane-padded to 128 cols): Linear + Tanh, scaled.
    h = jnp.dot(h.astype(mm_dt), w3_ref[...],
                preferred_element_type=jnp.float32) + b3_ref[...]
    o_ref[...] = (act_limit * jnp.tanh(h)).astype(o_ref.dtype)


def mlp_goal_actor_forward(obs, goal, params, act_limit, *,
                           hidden_activation="relu",
                           batch_tile=512,
                           matmul_dtype=jnp.bfloat16):
    """obs: (B, obs_dim), goal: (B, goal_dim) -> (B, act_dim), float32."""
    w1, b1, w2, b2, w3, b3 = params
    B, obs_dim = obs.shape
    goal_dim = goal.shape[1]
    act_dim = w3.shape[1]

    # --- wrapper-side layout prep (pure XLA glue, all tiny) ---------------
    # Split layer-1 weight so obs/goal concat fuses into two matmuls.
    w1o = w1[:obs_dim].astype(matmul_dtype)
    w1g = w1[obs_dim:].astype(matmul_dtype)
    w2c = w2.astype(matmul_dtype)
    # Zero-pad the final layer to a lane-dense (multiple of 128) output width.
    out_cols = _round_up(act_dim, 128)
    w3p = jnp.pad(w3, ((0, 0), (0, out_cols - act_dim))).astype(matmul_dtype)
    b3p = jnp.pad(b3, ((0, 0), (0, out_cols - act_dim))).astype(jnp.float32)
    b1f = b1.astype(jnp.float32)
    b2f = b2.astype(jnp.float32)

    # Batch tiling: pick a sublane-aligned tile, pad batch to a multiple.
    tb = max(8, min(int(batch_tile), _round_up(B, 8)))
    b_pad = _round_up(B, tb)
    if b_pad != B:
        obs = jnp.pad(obs, ((0, b_pad - B), (0, 0)))
        goal = jnp.pad(goal, ((0, b_pad - B), (0, 0)))
    grid = (b_pad // tb,)

    def batch_spec(d):
        return pl.BlockSpec((tb, d), lambda i: (i, 0))

    def resident_spec(arr):
        return pl.BlockSpec(arr.shape, lambda i: (0, 0))

    kernel = functools.partial(_actor_kernel,
                               act_limit=float(act_limit),
                               hidden_activation=hidden_activation)

    out_padded = pl.pallas_call(
        kernel,
        out_shape=jax.ShapeDtypeStruct((b_pad, out_cols), jnp.float32),
        grid=grid,
        in_specs=[
            batch_spec(obs_dim),          # obs tile
            batch_spec(goal_dim),         # goal tile
            resident_spec(w1o), resident_spec(w1g), resident_spec(b1f),
            resident_spec(w2c), resident_spec(b2f),
            resident_spec(w3p), resident_spec(b3p),
        ],
        out_specs=pl.BlockSpec((tb, out_cols), lambda i: (i, 0)),
        compiler_params=pltpu.CompilerParams(
            dimension_semantics=("parallel",)),
    )(obs, goal, w1o, w1g, b1f, w2c, b2f, w3p, b3p)

    return out_padded[:B, :act_dim]


def init_params(key, sizes):
    """PyTorch-Linear-style init; weights stored (in, out), biases (1, out)."""
    params = []
    for j in range(len(sizes) - 1):
        fan_in, fan_out = sizes[j], sizes[j + 1]
        key, kw, kb = jax.random.split(key, 3)
        bound = 1.0 / jnp.sqrt(float(fan_in))
        w = jax.random.uniform(kw, (fan_in, fan_out), jnp.float32,
                               minval=-bound, maxval=bound)
        b = jax.random.uniform(kb, (1, fan_out), jnp.float32,
                               minval=-bound, maxval=bound)
        params += [w, b]
    return params


def _reference(obs, goal, params, act_limit, hidden_activation, matmul_dtype):
    """Pure-JAX reference using the identical bf16-operand / f32-acc math."""
    w1, b1, w2, b2, w3, b3 = params
    obs_dim = obs.shape[1]
    w1o = w1[:obs_dim].astype(matmul_dtype)
    w1g = w1[obs_dim:].astype(matmul_dtype)
    h = (jnp.dot(obs.astype(matmul_dtype), w1o, preferred_element_type=jnp.float32)
         + jnp.dot(goal.astype(matmul_dtype), w1g, preferred_element_type=jnp.float32)
         + b1)
    h = _hidden_act(h, hidden_activation)
    h = jnp.dot(h.astype(matmul_dtype), w2.astype(matmul_dtype),
                preferred_element_type=jnp.float32) + b2
    h = _hidden_act(h, hidden_activation)
    h = jnp.dot(h.astype(matmul_dtype), w3.astype(matmul_dtype),
                preferred_element_type=jnp.float32) + b3
    return act_limit * jnp.tanh(h)


if __name__ == "__main__":
    # Small shapes consistent with the module.
    batch = 2
    obs_dim, goal_dim, act_dim = 12, 4, 8
    hidden_sizes = (32, 32)
    act_limit = 2.0
    hidden_activation = "relu"  # PyTorch module's `activation` arg; "tanh" also supported.

    key = jax.random.PRNGKey(0)
    key, ko, kg = jax.random.split(key, 3)
    obs = jax.random.normal(ko, (batch, obs_dim), jnp.float32)
    goal = jax.random.normal(kg, (batch, goal_dim), jnp.float32)

    pi_sizes = [obs_dim + goal_dim] + list(hidden_sizes) + [act_dim]
    params = init_params(key, pi_sizes)

    out = mlp_goal_actor_forward(obs, goal, params, act_limit,
                                 hidden_activation=hidden_activation)
    jax.block_until_ready(out)

    ref = _reference(obs, goal, params, act_limit, hidden_activation,
                     jnp.bfloat16)
    assert out.shape == (batch, act_dim)
    assert jnp.allclose(out, ref, atol=1e-3, rtol=1e-3), "mismatch vs reference"

    # Loose sanity check against the full-f32 module semantics.
    x = jnp.concatenate([obs, goal], axis=-1)
    w1, b1, w2, b2, w3, b3 = params
    ref32 = jnp.maximum(x @ w1 + b1, 0.0)
    ref32 = jnp.maximum(ref32 @ w2 + b2, 0.0)
    ref32 = act_limit * jnp.tanh(ref32 @ w3 + b3)
    assert jnp.allclose(out, ref32, atol=5e-2), "drifted from f32 semantics"

    print("KERNEL_OK")
</pallas_src>

<mosaic_0001>
module attributes {stable_mosaic.version = 11 : i64} {
  func.func @_actor_kernel(%arg0: i32, %arg1: memref<8x12xf32, #tpu.memory_space<vmem>>, %arg2: memref<8x4xf32, #tpu.memory_space<vmem>>, %arg3: memref<12x32xbf16, #tpu.memory_space<vmem>>, %arg4: memref<4x32xbf16, #tpu.memory_space<vmem>>, %arg5: memref<1x32xf32, #tpu.memory_space<vmem>>, %arg6: memref<32x32xbf16, #tpu.memory_space<vmem>>, %arg7: memref<1x32xf32, #tpu.memory_space<vmem>>, %arg8: memref<32x128xbf16, #tpu.memory_space<vmem>>, %arg9: memref<1x128xf32, #tpu.memory_space<vmem>>, %arg10: memref<8x128xf32, #tpu.memory_space<vmem>>) attributes {dimension_semantics = [#tpu.dimension_semantics<parallel>], iteration_bounds = array<i64: 1>, scalar_prefetch = 0 : i64, scratch_operands = 0 : i64, tpu.core_type = #tpu.core_type<tc>, window_params = [{transform_indices = @transform_0, window_bounds = array<i64: 8, 12>}, {transform_indices = @transform_1, window_bounds = array<i64: 8, 4>}, {pipeline_mode = #tpu.pipeline_mode<synchronous>, transform_indices = @transform_2, window_bounds = array<i64: 12, 32>}, {pipeline_mode = #tpu.pipeline_mode<synchronous>, transform_indices = @transform_3, window_bounds = array<i64: 4, 32>}, {pipeline_mode = #tpu.pipeline_mode<synchronous>, transform_indices = @transform_4, window_bounds = array<i64: 1, 32>}, {pipeline_mode = #tpu.pipeline_mode<synchronous>, transform_indices = @transform_5, window_bounds = array<i64: 32, 32>}, {pipeline_mode = #tpu.pipeline_mode<synchronous>, transform_indices = @transform_6, window_bounds = array<i64: 1, 32>}, {pipeline_mode = #tpu.pipeline_mode<synchronous>, transform_indices = @transform_7, window_bounds = array<i64: 32, 128>}, {pipeline_mode = #tpu.pipeline_mode<synchronous>, transform_indices = @transform_8, window_bounds = array<i64: 1, 128>}, {transform_indices = @transform_9, window_bounds = array<i64: 8, 128>}]} {
    %c0 = arith.constant 0 : index
    %c0_0 = arith.constant 0 : index
    %0 = vector.load %arg1[%c0, %c0_0] : memref<8x12xf32, #tpu.memory_space<vmem>>, vector<8x12xf32>
    %1 = arith.truncf %0 : vector<8x12xf32> to vector<8x12xbf16>
    %c0_1 = arith.constant 0 : index
    %c0_2 = arith.constant 0 : index
    %2 = vector.load %arg3[%c0_1, %c0_2] : memref<12x32xbf16, #tpu.memory_space<vmem>>, vector<12x32xbf16>
    %cst = arith.constant dense<0.000000e+00> : vector<8x32xf32>
    %3 = tpu.matmul %1, %2, %cst {dimension_numbers = #tpu.dot_dimension_numbers<[1], [0], [0], [1], [0, 0, 1, 1], [], []>} : vector<8x12xbf16>, vector<12x32xbf16>, vector<8x32xf32> -> vector<8x32xf32>
    %c0_3 = arith.constant 0 : index
    %c0_4 = arith.constant 0 : index
    %4 = vector.load %arg2[%c0_3, %c0_4] : memref<8x4xf32, #tpu.memory_space<vmem>>, vector<8x4xf32>
    %5 = arith.truncf %4 : vector<8x4xf32> to vector<8x4xbf16>
    %c0_5 = arith.constant 0 : index
    %c0_6 = arith.constant 0 : index
    %6 = vector.load %arg4[%c0_5, %c0_6] : memref<4x32xbf16, #tpu.memory_space<vmem>>, vector<4x32xbf16>
    %cst_7 = arith.constant dense<0.000000e+00> : vector<8x32xf32>
    %7 = tpu.matmul %5, %6, %cst_7 {dimension_numbers = #tpu.dot_dimension_numbers<[1], [0], [0], [1], [0, 0, 1, 1], [], []>} : vector<8x4xbf16>, vector<4x32xbf16>, vector<8x32xf32> -> vector<8x32xf32>
    %8 = arith.addf %3, %7 : vector<8x32xf32>
    %c0_8 = arith.constant 0 : index
    %c0_9 = arith.constant 0 : index
    %9 = vector.load %arg5[%c0_8, %c0_9] : memref<1x32xf32, #tpu.memory_space<vmem>>, vector<1x32xf32>
    %10 = vector.broadcast %9 : vector<1x32xf32> to vector<8x32xf32>
    %11 = arith.addf %8, %10 : vector<8x32xf32>
    %cst_10 = arith.constant 0.000000e+00 : f32
    %12 = vector.broadcast %cst_10 : f32 to vector<8x32xf32>
    %13 = arith.maximumf %11, %12 : vector<8x32xf32>
    %14 = arith.truncf %13 : vector<8x32xf32> to vector<8x32xbf16>
    %c0_11 = arith.constant 0 : index
    %c0_12 = arith.constant 0 : index
    %15 = vector.load %arg6[%c0_11, %c0_12] : memref<32x32xbf16, #tpu.memory_space<vmem>>, vector<32x32xbf16>
    %cst_13 = arith.constant dense<0.000000e+00> : vector<8x32xf32>
    %16 = tpu.matmul %14, %15, %cst_13 {dimension_numbers = #tpu.dot_dimension_numbers<[1], [0], [0], [1], [0, 0, 1, 1], [], []>} : vector<8x32xbf16>, vector<32x32xbf16>, vector<8x32xf32> -> vector<8x32xf32>
    %c0_14 = arith.constant 0 : index
    %c0_15 = arith.constant 0 : index
    %17 = vector.load %arg7[%c0_14, %c0_15] : memref<1x32xf32, #tpu.memory_space<vmem>>, vector<1x32xf32>
    %18 = vector.broadcast %17 : vector<1x32xf32> to vector<8x32xf32>
    %19 = arith.addf %16, %18 : vector<8x32xf32>
    %cst_16 = arith.constant 0.000000e+00 : f32
    %20 = vector.broadcast %cst_16 : f32 to vector<8x32xf32>
    %21 = arith.maximumf %19, %20 : vector<8x32xf32>
    %22 = arith.truncf %21 : vector<8x32xf32> to vector<8x32xbf16>
    %c0_17 = arith.constant 0 : index
    %c0_18 = arith.constant 0 : index
    %23 = vector.load %arg8[%c0_17, %c0_18] : memref<32x128xbf16, #tpu.memory_space<vmem>>, vector<32x128xbf16>
    %cst_19 = arith.constant dense<0.000000e+00> : vector<8x128xf32>
    %24 = tpu.matmul %22, %23, %cst_19 {dimension_numbers = #tpu.dot_dimension_numbers<[1], [0], [0], [1], [0, 0, 1, 1], [], []>} : vector<8x32xbf16>, vector<32x128xbf16>, vector<8x128xf32> -> vector<8x128xf32>
    %c0_20 = arith.constant 0 : index
    %c0_21 = arith.constant 0 : index
    %25 = vector.load %arg9[%c0_20, %c0_21] : memref<1x128xf32, #tpu.memory_space<vmem>>, vector<1x128xf32>
    %26 = vector.broadcast %25 : vector<1x128xf32> to vector<8x128xf32>
    %27 = arith.addf %24, %26 : vector<8x128xf32>
    %28 = math.tanh %27 : vector<8x128xf32>
    %cst_22 = arith.constant 2.000000e+00 : f32
    %29 = vector.broadcast %cst_22 : f32 to vector<8x128xf32>
    %30 = arith.mulf %29, %28 : vector<8x128xf32>
    %c0_23 = arith.constant 0 : index
    %c0_24 = arith.constant 0 : index
    %31 = vector.load %arg10[%c0_23, %c0_24] : memref<8x128xf32, #tpu.memory_space<vmem>>, vector<8x128xf32>
    tpu.vector_store %arg10[%c0_23, %c0_24], %30 {strides = array<i32>} : memref<8x128xf32, #tpu.memory_space<vmem>>, vector<8x128xf32>,
    return
  }
  func.func @transform_0(%arg0: i32) -> (i32, i32) {
    %c0_i32 = arith.constant 0 : i32
    %c0_i32_0 = arith.constant 0 : i32
    return %arg0, %c0_i32 : i32, i32
  }
  func.func @transform_1(%arg0: i32) -> (i32, i32) {
    %c0_i32 = arith.constant 0 : i32
    %c0_i32_0 = arith.constant 0 : i32
    return %arg0, %c0_i32 : i32, i32
  }
  func.func @transform_2(%arg0: i32) -> (i32, i32) {
    %c0_i32 = arith.constant 0 : i32
    %c0_i32_0 = arith.constant 0 : i32
    %c0_i32_1 = arith.constant 0 : i32
    return %c0_i32, %c0_i32_0 : i32, i32
  }
  func.func @transform_3(%arg0: i32) -> (i32, i32) {
    %c0_i32 = arith.constant 0 : i32
    %c0_i32_0 = arith.constant 0 : i32
    %c0_i32_1 = arith.constant 0 : i32
    return %c0_i32, %c0_i32_0 : i32, i32
  }
  func.func @transform_4(%arg0: i32) -> (i32, i32) {
    %c0_i32 = arith.constant 0 : i32
    %c0_i32_0 = arith.constant 0 : i32
    %c0_i32_1 = arith.constant 0 : i32
    return %c0_i32, %c0_i32_0 : i32, i32
  }
  func.func @transform_5(%arg0: i32) -> (i32, i32) {
    %c0_i32 = arith.constant 0 : i32
    %c0_i32_0 = arith.constant 0 : i32
    %c0_i32_1 = arith.constant 0 : i32
    return %c0_i32, %c0_i32_0 : i32, i32
  }
  func.func @transform_6(%arg0: i32) -> (i32, i32) {
    %c0_i32 = arith.constant 0 : i32
    %c0_i32_0 = arith.constant 0 : i32
    %c0_i32_1 = arith.constant 0 : i32
    return %c0_i32, %c0_i32_0 : i32, i32
  }
  func.func @transform_7(%arg0: i32) -> (i32, i32) {
    %c0_i32 = arith.constant 0 : i32
    %c0_i32_0 = arith.constant 0 : i32
    %c0_i32_1 = arith.constant 0 : i32
    return %c0_i32, %c0_i32_0 : i32, i32
  }
  func.func @transform_8(%arg0: i32) -> (i32, i32) {
    %c0_i32 = arith.constant 0 : i32
    %c0_i32_0 = arith.constant 0 : i32
    %c0_i32_1 = arith.constant 0 : i32
    return %c0_i32, %c0_i32_0 : i32, i32
  }
  func.func @transform_9(%arg0: i32) -> (i32, i32) {
    %c0_i32 = arith.constant 0 : i32
    %c0_i32_0 = arith.constant 0 : i32
    return %arg0, %c0_i32 : i32, i32
  }
}

</mosaic_0001>

<bundles_post_ra>
// kernel: tpu_custom_call.1
= control target key start
LH: loop header
LB: loop body
LE: loop exit
PB: predicated region body
PF: predicated region fallthrough
CT: control target
= control target key end

     0   :  { %14 = vsyncpa [#allocation3], 0  ;;  %s684_s0 = inlined_call_operand.hbm [shape: f32[8,12], index: 0, kind: input, shape index: {}]   ;;  %s685_s1 = inlined_call_operand.vmem [shape: f32[8,4], index: 1, kind: input, shape index: {}]   ;;  %s686_s2 = inlined_call_operand.hbm [shape: bf16[12,32], index: 2, kind: input, shape index: {}]   ;;  %s687_s3 = inlined_call_operand.vmem [shape: bf16[4,32], index: 3, kind: input, shape index: {}]   ;;  %s688_s4 = inlined_call_operand.hbm [shape: f32[1,32], index: 4, kind: input, shape index: {}]   ;;  %s689_s5 = inlined_call_operand.vmem [shape: bf16[32,32], index: 5, kind: input, shape index: {}]   ;;  %s690_s6 = inlined_call_operand.hbm [shape: f32[1,32], index: 6, kind: input, shape index: {}]   ;;  %s691_s7 = inlined_call_operand.vmem [shape: bf16[32,128], index: 7, kind: input, shape index: {}]   ;;  %s692_s8 = inlined_call_operand.vmem [shape: f32[1,128], index: 8, kind: input, shape index: {}]   ;;  %s693_s9 = inlined_call_operand.hbm [shape: f32[8,128], index: 9, kind: output, shape index: {}]  }
   0x1   :  { %15 = vsyncpa [#allocation6], 0 }
   0x2   :  { %16 = vsyncpa [#allocation9], 0 }
   0x3   :  { %17 = vsyncpa [#allocation4], 0  ;;  %s540_s30 = smov [#allocation5]   ;;  %s422_s13 = scalar_lea.hbm %s686_s2, 128 }
   0x4   :  { %s35_s10 = sshll.u32 %s540_s30, 4  ;;  %p423_p0 = scmp.ne.s32.totalorder %s686_s2, %s422_s13  ;;  %s36_s10 = int_to_ptr.vmem [resolvable:$true] %s35_s10 }
   0x5   :  { %p426_p1 = scmp.lt.u32.totalorder %s422_s13, %s686_s2 }
   0x7   :  { %p428_p2 = pnand %p426_p1, %p423_p0 }
   0x9   :  { %431 = shalt.err (!%p428_p2)
}
   0xa   :  { %s432_s18 = scalar_lea.vmem %s36_s10, 128  ;;  %p437_p4 = scmp.lt.s32.totalorder %s36_s10, %s36_s10 }
   0xb   :  { %p433_p3 = scmp.ne.s32.totalorder %s36_s10, %s432_s18  ;;  %p438_p5 = scmp.lt.s32.totalorder %s432_s18, %s432_s18 }
   0xd   :  { %p439_p6 = por %p438_p5, %p437_p4 }
   0xf   :  { %p440_p7 = pnand %p439_p6, %p433_p3 }
  0x11   :  { %443 = shalt.err (!%p440_p7)
}
  0x12   :  { %s541_s19 = smov 64   ;;  %s542_s20 = smov 4  }
  0x13   :  { %41 = dma.hbm_to_vmem [thread:$0]  %s686_s2, 128, %s36_s10, [#allocation6], %s541_s19, %s541_s19, %s542_s20  }
  0x14   :  { %s543_s23 = smov [#allocation2]   ;;  %s544_s25 = smov [#allocation7]  }
  0x15   :  { %s24_s24 = sshll.u32 %s543_s23, 4  ;;  %s50_s26 = sshll.u32 %s544_s25, 4  ;;  %s25_s24 = int_to_ptr.vmem [resolvable:$true] %s24_s24  ;;  %s51_s26 = int_to_ptr.vmem [resolvable:$true] %s50_s26 }
  0x16   :  { %s444_s29 = scalar_lea.hbm %s684_s0, 128 }
  0x17   :  { %p445_p8 = scmp.ne.s32.totalorder %s684_s0, %s444_s29  ;;  %p448_p9 = scmp.lt.u32.totalorder %s444_s29, %s684_s0 }
  0x19   :  { %p450_p10 = pnand %p448_p9, %p445_p8 }
  0x1b   :  { %453 = shalt.err (!%p450_p10)
}
  0x1c   :  { %s454_s2 = scalar_lea.vmem %s25_s24, 128  ;;  %p459_p12 = scmp.lt.s32.totalorder %s25_s24, %s25_s24 }
  0x1d   :  { %p455_p11 = scmp.ne.s32.totalorder %s25_s24, %s454_s2  ;;  %p460_p13 = scmp.lt.s32.totalorder %s454_s2, %s454_s2 }
  0x1f   :  { %p461_p0 = por %p460_p13, %p459_p12 }
  0x21   :  { %p462_p1 = pnand %p461_p0, %p455_p11 }
  0x23   :  { %465 = shalt.err (!%p462_p1)
}
  0x24   :  { %27 = dma.hbm_to_vmem [thread:$0]  %s684_s0, 128, %s25_s24, [#allocation3]  }
  0x25   :  { %s466_s17 = scalar_lea.hbm %s688_s4, 16 }
  0x26   :  { %p467_p2 = scmp.ne.s32.totalorder %s688_s4, %s466_s17  ;;  %p470_p3 = scmp.lt.u32.totalorder %s466_s17, %s688_s4 }
  0x28   :  { %p472_p4 = pnand %p470_p3, %p467_p2 }
  0x2a   :  { %475 = shalt.err (!%p472_p4)
}
  0x2b   :  { %s476_s22 = scalar_lea.vmem %s51_s26, 16  ;;  %s480_s23 = scalar_lea.vmem %s51_s26, 32 }
  0x2c   :  { %p477_p5 = scmp.ne.s32.totalorder %s51_s26, %s476_s22  ;;  %p481_p6 = scmp.lt.s32.totalorder %s51_s26, %s51_s26 }
  0x2d   :  { %p482_p7 = scmp.lt.s32.totalorder %s480_s23, %s476_s22 }
  0x2f   :  { %p483_p8 = por %p482_p7, %p481_p6 }
  0x31   :  { %p484_p9 = pnand %p483_p8, %p477_p5 }
  0x33   :  { %487 = shalt.err (!%p484_p9)
}
  0x34   :  { %53 = dma.hbm_to_vmem [thread:$0]  %s688_s4, 16, %s51_s26, [#allocation6]  }
  0x35   :  { %s545_s25 = smov [#allocation8]   ;;  %s488_s30 = scalar_lea.hbm %s690_s6, 16 }
  0x36   :  { %s62_s27 = sshll.u32 %s545_s25, 4  ;;  %p489_p10 = scmp.ne.s32.totalorder %s690_s6, %s488_s30  ;;  %s63_s27 = int_to_ptr.vmem [resolvable:$true] %s62_s27 }
  0x37   :  { %p492_p11 = scmp.lt.u32.totalorder %s488_s30, %s690_s6 }
  0x39   :  { %p494_p12 = pnand %p492_p11, %p489_p10 }
  0x3b   :  { %497 = shalt.err (!%p494_p12)
}
  0x3c   :  { %s498_s10 = scalar_lea.vmem %s63_s27, 16  ;;  %s502_s4 = scalar_lea.vmem %s63_s27, 32 }
  0x3d   :  { %p499_p13 = scmp.ne.s32.totalorder %s63_s27, %s498_s10  ;;  %p503_p0 = scmp.lt.s32.totalorder %s63_s27, %s63_s27 }
  0x3e   :  { %p504_p1 = scmp.lt.s32.totalorder %s502_s4, %s498_s10 }
  0x40   :  { %p505_p2 = por %p504_p1, %p503_p0 }
  0x42   :  { %p506_p3 = pnand %p505_p2, %p499_p13 }
  0x44   :  { %509 = shalt.err (!%p506_p3)
}
  0x45   :  { %65 = dma.hbm_to_vmem [thread:$0]  %s690_s6, 16, %s63_s27, [#allocation9]  }
  0x46   :  { %532 = dma.done.wait [#allocation3], 128  }
  0x47   :  { %533 = vsyncadd [#allocation3], 4294967168 }
  0x48   :  { %534 = dma.done.wait [#allocation6], 144  }
  0x49   :  { %535 = vsyncadd [#allocation6], 4294967152 }
  0x4a   :  { %536 = dma.done.wait [#allocation9], 16  }
  0x4b   :  { %537 = vsyncadd [#allocation9], 4294967280  ;;  %v546_v0 = vmov 0.0   ;;  %vm547_vm0 = vmmov 0   ;;  %vm94_vm1 = vcmask 1041408   ;;  %vm147_vm2 = vcmask 1045504  }
  0x4c   :  { %378 = vmatprep.subr.bf16.mxu0 %v546_v0  ;;  %384 = vmatprep.subr.bf16.mxu1 %v546_v0  ;;  %v89_v1 = vld [vmem:[%s687_s3] sm:$0x3]  ;;  %v415_v3 = vld [vmem:[#allocation5] sm:$0x3f]   ;;  %vm90_vm3 = vcmask 31744   ;;  %vm143_vm4 = vcmask 97280  }
  0x4d   :  { %380 = vmatprep.mubr.msk.bf16.mxu0 %vm547_vm0, %v546_v0  ;;  %386 = vmatprep.mubr.msk.bf16.mxu1 %vm547_vm0, %v546_v0  ;;  %v96_v2 = vsel %vm94_vm1, %v89_v1, 0  ;;  %v87_v4 = vld [vmem:[%s685_s1] sm:$0xff]  ;;  %v149_v7 = vsel %vm147_vm2, %v415_v3, 0  ;;  %v417_v10 = vld [vmem:[%s689_s5 + $0x8] sm:$0xff]   ;;  %v359_v16 = vld [vmem:[#allocation7] ss:$0 sm:$0xff] }
  0x4e   :  { %v83_v5 = vld [vmem:[#allocation2] sm:$0xff]  ;;  %379 = vmatpush3.bf16.msra.mxu0 %v96_v2  ;;  %v88_v6 = vpack.c.bf16 %v87_v4, %v87_v4  ;;  %385 = vmatpush3.bf16.msra.mxu1 %v149_v7  ;;  %vm224_vm5 = vcmask 261120   ;;  %v419_v25 = vld [vmem:[%s691_s7 + $0x8] sm:$0xff]   ;;  %v360_v26 = vld [vmem:[#allocation8] ss:$0 sm:$0xff] }
  0x4f   :  { %v84_v8 = vpack.c.bf16 %v83_v5, %v83_v5  ;;  %390 = vmatprep.subr.bf16.mxu0 %v546_v0  ;;  %398 = vmatprep.subr.bf16.mxu1 %v546_v0  ;;  %v416_v9 = vld [vmem:[%s689_s5] sm:$0xff]  }
  0x50   :  { %v418_v11 = vld [vmem:[%s691_s7] sm:$0xff]   ;;  %s548_s7 = smov [#allocation10]  }
  0x51   :  { %381 = vmatmul.mubr.msk.bf16.vlgmr.msra.gmra.mrb[0].mxu0 %vm90_vm3, %v88_v6  ;;  %387 = vmatmul.mubr.msk.bf16.vlgmr.msra.gmra.mrb[0].mxu1 %vm143_vm4, %v84_v8  ;;  %v364_v34 = vld [vmem:[%s692_s8] ss:$0 sm:$0xff]  ;;  %s345_s24 = sshll.u32 %s548_s7, 4  ;;  %s346_s24 = int_to_ptr.vmem [resolvable:$true] %s345_s24 }
  0x52   :  { %394 = vmatprep.mubr.msk.bf16.mxu0 %vm547_vm0, %v546_v0  ;;  %402 = vmatprep.mubr.msk.bf16.mxu1 %vm547_vm0, %v546_v0  ;;  %s510_s25 = scalar_lea.vmem %s346_s24, 128  ;;  %p515_p5 = scmp.lt.s32.totalorder %s346_s24, %s346_s24 }
  0x53   :  { %391 = vmatpush3.bf16.msra.mxu0 %v416_v9  ;;  %399 = vmatpush3.bf16.msra.mxu1 %v418_v11  ;;  %p511_p4 = scmp.ne.s32.totalorder %s346_s24, %s510_s25  ;;  %p516_p6 = scmp.lt.s32.totalorder %s510_s25, %s510_s25 }
  0x54   :  { %392 = vmatprep.subr.bf16.mxu0 %v546_v0  ;;  %400 = vmatprep.subr.bf16.mxu1 %v546_v0 }
  0x55   :  { %p517_p7 = por %p516_p6, %p515_p5 }
  0x57   :  { %393 = vmatpush3.bf16.msra.mxu0 %v417_v10  ;;  %401 = vmatpush3.bf16.msra.mxu1 %v419_v25  ;;  %p518_p8 = pnand %p517_p7, %p511_p4 }
 0x124   :  { %v132_v12 = vpop.f32.mrb[0].mxu0  ;;  %v185_v15 = vpop.f32.mrb[0].mxu1 }
 0x125   :  { %v382_v13 = vpop.f32.mrb[1].mxu0  ;;  %v186_v17 = vadd.f32 %v185_v15, %v132_v12  ;;  %v388_v19 = vpop.f32.mrb[1].mxu1 }
 0x126   :  { %v135_v14 = vpop.f32.mrb[2].mxu0  ;;  %v188_v20 = vpop.f32.mrb[2].mxu1 }
 0x127   :  { %v383_v18 = vpop.f32.mrb[3].mxu0  ;;  %v198_v21 = vadd.f32 %v359_v16, %v186_v17  ;;  %v389_v22 = vpop.f32.mrb[3].mxu1 }
 0x129   :  { %v199_v23 = vmax.f32 %v198_v21, 0.0 }
 0x12b   :  { %v200_v24 = vpack.c.bf16 %v199_v23, %v199_v23 }
 0x12d   :  { %395 = vmatmul.mubr.msk.bf16.vlgmr.msra.gmra.mrb[4].mxu0 %vm224_vm5, %v200_v24 }
 0x200   :  { %v262_v27 = vpop.f32.mrb[4].mxu0 }
 0x201   :  { %v263_v28 = vadd.f32 %v360_v26, %v262_v27  ;;  %v396_v29 = vpop.f32.mrb[5].mxu0 }
 0x202   :  { %v265_v30 = vpop.f32.mrb[6].mxu0 }
 0x203   :  { %v268_v31 = vmax.f32 %v263_v28, 0.0  ;;  %v397_v32 = vpop.f32.mrb[7].mxu0 }
 0x205   :  { %v269_v33 = vpack.c.bf16 %v268_v31, %v268_v31 }
 0x207   :  { %403 = vmatmul.mubr.msk.bf16.vlgmr.msra.gmra.mrb[4].mxu1 %vm224_vm5, %v269_v33 }
 0x2da   :  { %v330_v35 = vpop.f32.mrb[4].mxu1 }
 0x2db   :  { %v331_v36 = vadd.f32 %v364_v34, %v330_v35  ;;  %v404_v37 = vpop.f32.mrb[5].mxu1 }
 0x2dc   :  { %v333_v38 = vpop.f32.mrb[6].mxu1 }
 0x2dd   :  { %420 = vtanh.f32 %v331_v36  ;;  %v405_v39 = vpop.f32.mrb[7].mxu1 }
 0x2e7   :  { %v421_v40 = vpop.eup %420 }
 0x2e8   :  { %v337_v41 = vmul.f32 2.0, %v421_v40 }
 0x2ea   :  { %338 = vst [vmem:[#allocation10] sm:$0xff] %v337_v41 }
 0x2eb   :  { %521 = shalt.err (!%p518_p8)
}
 0x2ec   :  { %s522_s28 = scalar_lea.hbm %s693_s9, 128 }
 0x2ed   :  { %p523_p9 = scmp.ne.s32.totalorder %s693_s9, %s522_s28  ;;  %p526_p10 = scmp.lt.u32.totalorder %s522_s28, %s693_s9 }
 0x2ef   :  { %p528_p11 = pnand %p526_p10, %p523_p9 }
 0x2f1   :  { %531 = shalt.err (!%p528_p11)
}
 0x2f2   :  { %348 = dma.vmem_to_hbm [thread:$0]  %s346_s24, 128, %s693_s9, [#allocation4]  }
 0x2f3   :  { %538 = dma.done.wait [#allocation4], 128  }
 0x2f4   :  { %539 = vsyncadd [#allocation4], 4294967168 }
 0x2f5   :  { %352 = vsyncpa [#allocation3], 1 }
 0x2f6   :  { %353 = vsyncpa [#allocation6], 1 }
 0x2f7   :  { %354 = vsyncpa [#allocation9], 1 }
 0x2f8   :  { %355 = vsyncpa [#allocation4], 1 }

</bundles_post_ra>
